<compile_context>
chip_gen: v7x
topology: tpu7x:2x2x1
jax: 0.10.0
libtpu: 0.0.40
codegen_flags: <defaults>
</compile_context>

<pallas_src>
import functools

import jax
import jax.numpy as jnp
from jax.experimental import pallas as pl
from jax.experimental.pallas import tpu as pltpu


def xelayer_kernel(x_ref, L_ref, w_ref, b_ref, o_ref, proj_ref, *,
                   graph_num, hid, f_out, flat_out):
    # x_ref   : (bt, N, F_in)        resident across node tiles (index map ignores i)
    # L_ref   : (G, bt, tn, N)       native layout, no wrapper transpose
    # w_ref   : (F_in, 2*F_out)      fused [linear | bypass] weight
    # b_ref   : (1, 2*F_out)         fused [linear | bypass] bias
    # o_ref   : (bt, tn*F_out) if flat_out else (bt, tn, F_out)
    # proj_ref: (bt, N, 2*F_out) f32 VMEM scratch holding the fused projection
    bt, n_full, f_in = x_ref.shape
    tn = L_ref.shape[2]
    i = pl.program_id(1)

    # Fused linear + bypass projection: one MXU dot per batch tile (nodes folded
    # into M), computed once at the first node tile and cached in VMEM scratch.
    @pl.when(i == 0)
    def _project():
        xm = x_ref[...].reshape(bt * n_full, f_in)
        proj = jnp.dot(xm, w_ref[...], preferred_element_type=jnp.float32) + b_ref[...]
        proj_ref[...] = proj.reshape(bt, n_full, 2 * f_out)

    # linear(x) for ALL nodes (the graph operator contracts over j); cast to the
    # mixing dtype (== L's dtype, e.g. bf16) only for the MXU operands.
    xx = proj_ref[...][..., :f_out].astype(L_ref.dtype)            # (bt, N, F_out)
    # bypass(x) only for this node tile's rows; stays f32 for the final add.
    row0 = pl.multiple_of(i * tn, tn)
    byp = proj_ref[:, pl.ds(row0, tn), :][..., f_out:]             # (bt, tn, F_out)

    # Per-graph mixing (static unroll over the small graph axis). Each L slab is
    # streamed from VMEM here rather than materialized up front.
    parts = []
    for g in range(graph_num):
        Lg = L_ref[g]                                              # (bt, tn, N)
        xg = xx[..., g * hid:(g + 1) * hid]                        # (bt, N, hid)
        parts.append(jnp.einsum('bij,bjh->bih', Lg, xg,
                                preferred_element_type=jnp.float32))
    h = parts[0] if graph_num == 1 else jnp.concatenate(parts, axis=-1)

    out = (byp + h).astype(o_ref.dtype)                            # (bt, tn, F_out)
    if flat_out:
        out = out.reshape(bt, tn * f_out)                          # lane-dense store
    o_ref[...] = out


def _step_vmem_bytes(bt, tn, N, F_in, F_out, G, l_bytes, io_bytes):
    """Rough per-step VMEM footprint: double-buffered blocks + scratch + temps."""
    l_blk = 2 * G * bt * tn * N * l_bytes          # dominant term
    x_blk = 2 * bt * N * F_in * io_bytes
    o_blk = 2 * bt * tn * F_out * io_bytes
    w_blk = 2 * (F_in + 1) * 2 * F_out * 4
    proj = bt * N * 2 * F_out * 4                  # VMEM scratch
    temps = 4 * bt * tn * F_out * 4                # xx/h/concat/out slack
    return l_blk + x_blk + o_blk + w_blk + proj + temps


def _pick_tiles(B, N, F_in, F_out, G, l_bytes, io_bytes, budget):
    """Largest (batch_tile, node_tile) whose working set fits the byte budget."""
    b_divs = sorted((d for d in range(1, B + 1) if B % d == 0), reverse=True)
    n_divs = [N] + sorted((d for d in range(8, N) if N % d == 0 and d % 8 == 0),
                          reverse=True)
    for tn in n_divs:
        for bt in b_divs:
            if _step_vmem_bytes(bt, tn, N, F_in, F_out, G, l_bytes, io_bytes) <= budget:
                return bt, tn
    return 1, n_divs[-1]


def prepare_xelayer_params(wl, bl, wb, bb):
    """One-time fusion of linear+bypass parameters (keep out of the per-call path)."""
    assert wl.shape == wb.shape, "linear/bypass weights must share (F_in, F_out)"
    assert bl.shape == bb.shape, "linear/bypass biases must share (1, F_out)"
    assert wl.dtype == wb.dtype and bl.dtype == bb.dtype, "parameter dtypes must match"
    return jnp.concatenate([wl, wb], axis=1), jnp.concatenate([bl, bb], axis=1)


def xelayer(x, L, w_cat, b_cat, graph_num, *,
            batch_tile=None, node_tile=None,
            vmem_limit_bytes=48 * 1024 * 1024,
            mixing_dtype=None, l_buffer_count=None):
    B, N, F_in = x.shape
    G = graph_num
    assert w_cat.shape[0] == F_in and w_cat.shape[1] % 2 == 0
    F_out = w_cat.shape[1] // 2
    assert F_out % G == 0, "out_feature must be divisible by graph_num"
    hid = F_out // G
    assert L.shape == (G, B, N, N)
    assert b_cat.shape == (1, 2 * F_out)

    # Optional: run the mixing matmul in bf16 (halves L's HBM bytes, MXU-native on
    # v6e/v7x). Ideally L is already produced in bf16 upstream so this is a no-op.
    if mixing_dtype is not None and L.dtype != jnp.dtype(mixing_dtype):
        L = L.astype(mixing_dtype)

    budget = vmem_limit_bytes // 2   # headroom for compiler scratch / relayouts
    bt, tn = _pick_tiles(B, N, F_in, F_out, G,
                         L.dtype.itemsize, x.dtype.itemsize, budget)
    if batch_tile is not None:
        bt = batch_tile
    if node_tile is not None:
        tn = node_tile
    assert B % bt == 0 and N % tn == 0
    # TODO(synk): query the TPU generation to tune vmem_limit_bytes per chip (v6e can
    # go far above v7x's 64 MiB) and to force an even >=2-step batch grid on v7x.

    # Lane-dense output: write (bt, tn*F_out) slabs of a (B, N*F_out) array whenever
    # the tile satisfies the (8, 128) block constraints; otherwise fall back to 3-D.
    flat_out = (bt == B or bt % 8 == 0) and (tn == N or (tn * F_out) % 128 == 0)

    l_kwargs = {}
    if l_buffer_count is not None:        # e.g. 3 on v6e to hide DMA issue latency
        l_kwargs["pipeline_mode"] = pl.Buffered(l_buffer_count)

    in_specs = [
        pl.BlockSpec((bt, N, F_in), lambda b, i: (b, 0, 0)),
        pl.BlockSpec((G, bt, tn, N), lambda b, i: (0, b, i, 0), **l_kwargs),
        pl.BlockSpec((F_in, 2 * F_out), lambda b, i: (0, 0)),
        pl.BlockSpec((1, 2 * F_out), lambda b, i: (0, 0)),
    ]
    if flat_out:
        out_shape = jax.ShapeDtypeStruct((B, N * F_out), x.dtype)
        out_spec = pl.BlockSpec((bt, tn * F_out), lambda b, i: (b, i))
    else:
        out_shape = jax.ShapeDtypeStruct((B, N, F_out), x.dtype)
        out_spec = pl.BlockSpec((bt, tn, F_out), lambda b, i: (b, i, 0))

    kernel = functools.partial(xelayer_kernel, graph_num=G, hid=hid,
                               f_out=F_out, flat_out=flat_out)
    out = pl.pallas_call(
        kernel,
        out_shape=out_shape,
        grid_spec=pltpu.PrefetchScalarGridSpec(
            num_scalar_prefetch=0,
            grid=(B // bt, N // tn),
            in_specs=in_specs,
            out_specs=out_spec,
            scratch_shapes=[pltpu.VMEM((bt, N, 2 * F_out), jnp.float32)],
        ),
        compiler_params=pltpu.CompilerParams(
            dimension_semantics=("parallel", "arbitrary"),
            vmem_limit_bytes=vmem_limit_bytes,
        ),
    )(x, L, w_cat, b_cat)
    return out.reshape(B, N, F_out) if flat_out else out


def xelayer_ref(x, L, wl, bl, wb, bb, graph_num):
    """Pure-JAX reference mirroring the PyTorch forward."""
    F_out = wl.shape[1]
    hid = F_out // graph_num
    xx = jnp.einsum('bnf,fo->bno', x, wl) + bl[0]
    hs = [jnp.einsum('bij,bjh->bih', L[g], xx[..., g * hid:(g + 1) * hid])
          for g in range(graph_num)]
    h = jnp.concatenate(hs, axis=-1)
    byp = jnp.einsum('bnf,fo->bno', x, wb) + bb[0]
    return byp + h


if __name__ == "__main__":
    # Small shapes consistent with the module:
    #   batch=2, node_num=16, in_feature=8, out_feature=16, graph_num=2 (hid=8)
    B, N, F_in, F_out, G = 2, 16, 8, 16, 2

    key = jax.random.PRNGKey(0)
    kx, kL, k1, k2, k3, k4 = jax.random.split(key, 6)

    x = jax.random.normal(kx, (B, N, F_in), dtype=jnp.float32)
    L = jax.random.normal(kL, (G, B, N, N), dtype=jnp.float32)

    # Deterministic parameter init (nn.Linear-style uniform bound 1/sqrt(fan_in))
    bound = 1.0 / (F_in ** 0.5)
    wl = jax.random.uniform(k1, (F_in, F_out), jnp.float32, -bound, bound)
    bl = jax.random.uniform(k2, (1, F_out), jnp.float32, -bound, bound)
    wb = jax.random.uniform(k3, (F_in, F_out), jnp.float32, -bound, bound)
    bb = jax.random.uniform(k4, (1, F_out), jnp.float32, -bound, bound)

    # One-time parameter preparation (hoisted out of the per-call path).
    w_cat, b_cat = prepare_xelayer_params(wl, bl, wb, bb)

    out = xelayer(x, L, w_cat, b_cat, G)
    out = jax.block_until_ready(out)

    ref = xelayer_ref(x, L, wl, bl, wb, bb, G)
    assert out.shape == (B, N, F_out)
    assert jnp.allclose(out, ref, atol=1e-4, rtol=1e-4), "mismatch vs reference"

    print("KERNEL_OK")
</pallas_src>

<mosaic_0001>
module attributes {stable_mosaic.version = 11 : i64} {
  func.func @xelayer_kernel(%arg0: i32, %arg1: i32, %arg2: memref<2x16x8xf32, #tpu.memory_space<vmem>>, %arg3: memref<2x2x16x16xf32, #tpu.memory_space<vmem>>, %arg4: memref<8x32xf32, #tpu.memory_space<vmem>>, %arg5: memref<1x32xf32, #tpu.memory_space<vmem>>, %arg6: memref<2x256xf32, #tpu.memory_space<vmem>>, %arg7: memref<2x16x32xf32, #tpu.memory_space<vmem>>) attributes {dimension_semantics = [#tpu.dimension_semantics<parallel>, #tpu.dimension_semantics<arbitrary>], iteration_bounds = array<i64: 1, 1>, scalar_prefetch = 0 : i64, scratch_operands = 1 : i64, tpu.core_type = #tpu.core_type<tc>, window_params = [{transform_indices = @transform_0, window_bounds = array<i64: 2, 16, 8>}, {transform_indices = @transform_1, window_bounds = array<i64: 2, 2, 16, 16>}, {pipeline_mode = #tpu.pipeline_mode<synchronous>, transform_indices = @transform_2, window_bounds = array<i64: 8, 32>}, {pipeline_mode = #tpu.pipeline_mode<synchronous>, transform_indices = @transform_3, window_bounds = array<i64: 1, 32>}, {transform_indices = @transform_4, window_bounds = array<i64: 2, 256>}]} {
    %c0_i32 = arith.constant 0 : i32
    %0 = arith.cmpi eq, %arg1, %c0_i32 : i32
    %1 = arith.extui %0 : i1 to i32
    %c0_i32_0 = arith.constant 0 : i32
    %2 = arith.cmpi ne, %1, %c0_i32_0 : i32
    scf.if %2 {
      %c0_15 = arith.constant 0 : index
      %c0_16 = arith.constant 0 : index
      %c0_17 = arith.constant 0 : index
      %22 = vector.load %arg2[%c0_15, %c0_16, %c0_17] : memref<2x16x8xf32, #tpu.memory_space<vmem>>, vector<2x16x8xf32>
      %23 = vector.shape_cast %22 : vector<2x16x8xf32> to vector<32x8xf32>
      %c0_18 = arith.constant 0 : index
      %c0_19 = arith.constant 0 : index
      %24 = vector.load %arg4[%c0_18, %c0_19] : memref<8x32xf32, #tpu.memory_space<vmem>>, vector<8x32xf32>
      %cst_20 = arith.constant dense<0.000000e+00> : vector<32x32xf32>
      %25 = tpu.matmul %23, %24, %cst_20 {dimension_numbers = #tpu.dot_dimension_numbers<[1], [0], [0], [1], [0, 0, 1, 1], [], []>} : vector<32x8xf32>, vector<8x32xf32>, vector<32x32xf32> -> vector<32x32xf32>
      %c0_21 = arith.constant 0 : index
      %c0_22 = arith.constant 0 : index
      %26 = vector.load %arg5[%c0_21, %c0_22] : memref<1x32xf32, #tpu.memory_space<vmem>>, vector<1x32xf32>
      %27 = vector.broadcast %26 : vector<1x32xf32> to vector<32x32xf32>
      %28 = arith.addf %25, %27 : vector<32x32xf32>
      %29 = vector.shape_cast %28 : vector<32x32xf32> to vector<2x16x32xf32>
      %c0_23 = arith.constant 0 : index
      %c0_24 = arith.constant 0 : index
      %c0_25 = arith.constant 0 : index
      %30 = vector.load %arg7[%c0_23, %c0_24, %c0_25] : memref<2x16x32xf32, #tpu.memory_space<vmem>>, vector<2x16x32xf32>
      tpu.vector_store %arg7[%c0_23, %c0_24, %c0_25], %29 {strides = array<i32>} : memref<2x16x32xf32, #tpu.memory_space<vmem>>, vector<2x16x32xf32>,
    } else {
    }
    %c0 = arith.constant 0 : index
    %c0_1 = arith.constant 0 : index
    %c0_2 = arith.constant 0 : index
    %3 = vector.load %arg7[%c0, %c0_1, %c0_2] : memref<2x16x32xf32, #tpu.memory_space<vmem>>, vector<2x16x32xf32>
    %4 = vector.extract_strided_slice %3 {offsets = [0, 0, 0], sizes = [2, 16, 16], strides = [1, 1, 1]} : vector<2x16x32xf32> to vector<2x16x16xf32>
    %c16_i32 = arith.constant 16 : i32
    %5 = arith.muli %arg1, %c16_i32 : i32
    %6 = tpu.assume_multiple %5, 16 : i32
    %c0_3 = arith.constant 0 : index
    %7 = arith.index_cast %6 : i32 to index
    %c0_4 = arith.constant 0 : index
    %8 = vector.load %arg7[%c0_3, %7, %c0_4] : memref<2x16x32xf32, #tpu.memory_space<vmem>>, vector<2x16x32xf32>
    %9 = vector.extract_strided_slice %8 {offsets = [0, 0, 16], sizes = [2, 16, 16], strides = [1, 1, 1]} : vector<2x16x32xf32> to vector<2x16x16xf32>
    %c0_5 = arith.constant 0 : index
    %c0_6 = arith.constant 0 : index
    %c0_7 = arith.constant 0 : index
    %c0_8 = arith.constant 0 : index
    %10 = vector.load %arg3[%c0_5, %c0_6, %c0_7, %c0_8] : memref<2x2x16x16xf32, #tpu.memory_space<vmem>>, vector<1x2x16x16xf32>
    %11 = vector.shape_cast %10 : vector<1x2x16x16xf32> to vector<2x16x16xf32>
    %12 = vector.extract_strided_slice %4 {offsets = [0, 0, 0], sizes = [2, 16, 8], strides = [1, 1, 1]} : vector<2x16x16xf32> to vector<2x16x8xf32>
    "tpu.trace_start"() <{level = 10 : i32, message = "bij,bjh->bih"}> : () -> ()
    %cst = arith.constant dense<0.000000e+00> : vector<2x16x8xf32>
    %13 = tpu.matmul %11, %12, %cst {dimension_numbers = #tpu.dot_dimension_numbers<[2], [1], [1], [2], [0, 0, 0, 1, 1, 2], [0], [0]>} : vector<2x16x16xf32>, vector<2x16x8xf32>, vector<2x16x8xf32> -> vector<2x16x8xf32>
    "tpu.trace_stop"() : () -> ()
    %c1 = arith.constant 1 : index
    %c0_9 = arith.constant 0 : index
    %c0_10 = arith.constant 0 : index
    %c0_11 = arith.constant 0 : index
    %14 = vector.load %arg3[%c1, %c0_9, %c0_10, %c0_11] : memref<2x2x16x16xf32, #tpu.memory_space<vmem>>, vector<1x2x16x16xf32>
    %15 = vector.shape_cast %14 : vector<1x2x16x16xf32> to vector<2x16x16xf32>
    %16 = vector.extract_strided_slice %4 {offsets = [0, 0, 8], sizes = [2, 16, 8], strides = [1, 1, 1]} : vector<2x16x16xf32> to vector<2x16x8xf32>
    "tpu.trace_start"() <{level = 10 : i32, message = "bij,bjh->bih"}> : () -> ()
    %cst_12 = arith.constant dense<0.000000e+00> : vector<2x16x8xf32>
    %17 = tpu.matmul %15, %16, %cst_12 {dimension_numbers = #tpu.dot_dimension_numbers<[2], [1], [1], [2], [0, 0, 0, 1, 1, 2], [0], [0]>} : vector<2x16x16xf32>, vector<2x16x8xf32>, vector<2x16x8xf32> -> vector<2x16x8xf32>
    "tpu.trace_stop"() : () -> ()
    %18 = tpu.concatenate %13, %17 in 2 : vector<2x16x8xf32>, vector<2x16x8xf32> -> vector<2x16x16xf32>
    %19 = arith.addf %9, %18 : vector<2x16x16xf32>
    %20 = vector.shape_cast %19 : vector<2x16x16xf32> to vector<2x256xf32>
    %c0_13 = arith.constant 0 : index
    %c0_14 = arith.constant 0 : index
    %21 = vector.load %arg6[%c0_13, %c0_14] : memref<2x256xf32, #tpu.memory_space<vmem>>, vector<2x256xf32>
    tpu.vector_store %arg6[%c0_13, %c0_14], %20 {strides = array<i32>} : memref<2x256xf32, #tpu.memory_space<vmem>>, vector<2x256xf32>,
    return
  }
  func.func @transform_0(%arg0: i32, %arg1: i32) -> (i32, i32, i32) {
    %c0_i32 = arith.constant 0 : i32
    %c0_i32_0 = arith.constant 0 : i32
    %c0_i32_1 = arith.constant 0 : i32
    return %arg0, %c0_i32, %c0_i32_0 : i32, i32, i32
  }
  func.func @transform_1(%arg0: i32, %arg1: i32) -> (i32, i32, i32, i32) {
    %c0_i32 = arith.constant 0 : i32
    %c0_i32_0 = arith.constant 0 : i32
    %c0_i32_1 = arith.constant 0 : i32
    return %c0_i32, %arg0, %arg1, %c0_i32_0 : i32, i32, i32, i32
  }
  func.func @transform_2(%arg0: i32, %arg1: i32) -> (i32, i32) {
    %c0_i32 = arith.constant 0 : i32
    %c0_i32_0 = arith.constant 0 : i32
    %c0_i32_1 = arith.constant 0 : i32
    return %c0_i32, %c0_i32_0 : i32, i32
  }
  func.func @transform_3(%arg0: i32, %arg1: i32) -> (i32, i32) {
    %c0_i32 = arith.constant 0 : i32
    %c0_i32_0 = arith.constant 0 : i32
    %c0_i32_1 = arith.constant 0 : i32
    return %c0_i32, %c0_i32_0 : i32, i32
  }
  func.func @transform_4(%arg0: i32, %arg1: i32) -> (i32, i32) {
    %c0_i32 = arith.constant 0 : i32
    return %arg0, %arg1 : i32, i32
  }
}

</mosaic_0001>

<bundles_post_ra>
// kernel: tpu_custom_call.1
= control target key start
LH: loop header
LB: loop body
LE: loop exit
PB: predicated region body
PF: predicated region fallthrough
CT: control target
= control target key end

     0   :  { %9 = vsyncpa [#allocation4], 0  ;;  %s1106_s0 = inlined_call_operand.vmem [shape: f32[2,16,8], index: 0, kind: input, shape index: {}]   ;;  %s1107_s1 = inlined_call_operand.hbm [shape: f32[2,2,16,16], index: 1, kind: input, shape index: {}]   ;;  %s1108_s2 = inlined_call_operand.vmem [shape: f32[8,32], index: 2, kind: input, shape index: {}]   ;;  %s1109_s3 = inlined_call_operand.vmem [shape: f32[1,32], index: 3, kind: input, shape index: {}]   ;;  %s1110_s4 = inlined_call_operand.hbm [shape: f32[2,256], index: 4, kind: output, shape index: {}]  }
   0x1   :  { %10 = vsyncpa [#allocation5], 0  ;;  %s963_s15 = smov [#allocation3]   ;;  %s915_s19 = scalar_lea.hbm %s1107_s1, 1024 }
   0x2   :  { %s18_s16 = sshll.u32 %s963_s15, 4  ;;  %p916_p0 = scmp.ne.s32.totalorder %s1107_s1, %s915_s19  ;;  %s19_s16 = int_to_ptr.vmem [resolvable:$true] %s18_s16 }
   0x3   :  { %p919_p1 = scmp.lt.u32.totalorder %s915_s19, %s1107_s1 }
   0x5   :  { %p921_p2 = pnand %p919_p1, %p916_p0 }
   0x7   :  { %924 = shalt.err (!%p921_p2)
}
   0x8   :  { %s925_s24 = scalar_lea.vmem %s19_s16, 1024  ;;  %p930_p4 = scmp.lt.s32.totalorder %s19_s16, %s19_s16 }
   0x9   :  { %p926_p3 = scmp.ne.s32.totalorder %s19_s16, %s925_s24  ;;  %p931_p5 = scmp.lt.s32.totalorder %s925_s24, %s925_s24 }
   0xb   :  { %p932_p6 = por %p931_p5, %p930_p4 }
   0xd   :  { %p933_p7 = pnand %p932_p6, %p926_p3 }
   0xf   :  { %936 = shalt.err (!%p933_p7)
}
  0x10   :  { %s964_s25 = smov 128   ;;  %s965_s26 = smov 8  }
  0x11   :  { %24 = dma.hbm_to_vmem [thread:$0]  %s1107_s1, 1024, %s19_s16, [#allocation4], %s964_s25, %s964_s25, %s965_s26  }
  0x12   :  { %959 = dma.done.wait [#allocation4], 1024  }
  0x13   :  { %960 = vsyncadd [#allocation4], 4294966272  ;;  %vm48_vm0 = vcmask 64512   ;;  %v40_v0 = vld [vmem:[%s1108_s2] sm:$0xff]  ;;  %v37_v2 = vld [vmem:[%s1106_s0 + $0x8] sm:$0xff]  ;;  %vm165_vm1 = vcmask 130048  }
  0x14   :  { %v36_v1 = vld [vmem:[%s1106_s0] sm:$0xff]  ;;  %838 = vmatprep.subr.mxu0 %v40_v0  ;;  %v38_v3 = vld [vmem:[%s1106_s0 + $0x10] sm:$0xff]  ;;  %v39_v4 = vld [vmem:[%s1106_s0 + $0x18] sm:$0xff]  ;;  %vm146_vm2 = vcmask 261120   ;;  %s966_s0 = smov 120   ;;  %s968_s13 = smov 112  }
  0x15   :  { %840 = vmatprep.mubr.msk.f32.mxu0 %vm48_vm0, %v36_v1  ;;  %839 = vmatpush3.msra.mxu0 %v40_v0  ;;  %v161_v5 = vld [vmem:[#allocation3] sm:$0xff]  ;;  %v162_v24 = vld [vmem:[#allocation3 + $0x8] sm:$0xff]  ;;  %v163_v25 = vld [vmem:[#allocation3 + $0x10] sm:$0xff]  ;;  %v969_v62 = vmov 1983009808   ;;  %v572_v0 = vlaneseq  ;;  %s972_s14 = smov 32  }
  0x16   :  { %841 = vmatmul.mubr.msk.f32.vlgmr.msra.gmra.mrb[0].mxu0 %vm48_vm0, %v37_v2  ;;  %850 = vmatprep.mubr.msk.f32.mxu1 %vm165_vm1, %v161_v5  ;;  %v803_v6 = vld [vmem:[%s1109_s3] ss:$0 sm:$0xff]  ;;  %v164_v26 = vld [vmem:[#allocation3 + $0x18] sm:$0xff]  ;;  %v331_v27 = vld [vmem:[#allocation3 + $0x30] sm:$0xff]  ;;  %s967_s3 = smov 16   ;;  %v570_v63 = vunpack.c.l.s4 %v969_v62  ;;  %s973_s15 = smov 48  }
  0x17   :  { %843 = vmatprep.mubr.msk.f32.mxu0 %vm48_vm0, %v38_v3  ;;  %v329_v15 = vld [vmem:[#allocation3 + $0x20] sm:$0xff]  ;;  %v330_v35 = vld [vmem:[#allocation3 + $0x28] sm:$0xff]  ;;  %v332_v37 = vld [vmem:[#allocation3 + $0x38] sm:$0xff]  ;;  %v573_v2 = vshrl.u32 %v572_v0, 7  ;;  %v970_v3 = vmov 1934713408  }
  0x18   :  { %v571_v1 = vunpack.c.0.s8 %v570_v63  ;;  %s974_s16 = smov 64   ;;  %s975_s17 = smov 96   ;;  %vm759_vm3 = vcmask 392192   ;;  %vm761_vm4 = vcmask 523264   ;;  %vm763_vm5 = vcmask 654336  }
  0x19   :  { %s976_s18 = smov 80   ;;  %vm765_vm6 = vcmask 785408   ;;  %vm767_vm7 = vcmask 916480   ;;  %s977_s19 = smov [#allocation6]  }
  0x1a   :  { %844 = vmatmul.mubr.msk.f32.gmra.mrb[2].mxu0 %vm48_vm0, %v39_v4  ;;  %v601_v4 = vunpack.c.l.s4 %v970_v3  ;;  %s794_s20 = sshll.u32 %s977_s19, 4  ;;  %s795_s20 = int_to_ptr.vmem [resolvable:$true] %s794_s20 }
  0x1b   :  { %864 = vmatprep.mubr.msk.f32.mxu0 %vm165_vm1, %v329_v15  ;;  %s937_s21 = scalar_lea.vmem %s795_s20, 64  ;;  %p942_p9 = scmp.lt.s32.totalorder %s795_s20, %s795_s20 }
  0x1c   :  { %p938_p8 = scmp.ne.s32.totalorder %s795_s20, %s937_s21  ;;  %p943_p10 = scmp.lt.s32.totalorder %s937_s21, %s937_s21 }
  0x1e   :  { %p944_p11 = por %p943_p10, %p942_p9 }
  0x20   :  { %p945_p12 = pnand %p944_p11, %p938_p8 }
  0xe9   :  { %v842_v7 = vpop.f32.mrb[0].mxu0 }
  0xea   :  { %v133_v8 = vadd.f32 %v842_v7, %v803_v6  ;;  %v127_v9 = vpop.f32.mrb[1].mxu0  ;;  %v574_v7 = vsub.s32 %v571_v1, %v573_v2 }
  0xeb   :  { %v128_v10 = vadd.f32 %v803_v6, %v127_v9 }
  0xec   :  { %148 = vst.msk [vmem:[#allocation2 + $0x8] sm:$0xff] %vm146_vm2, %v133_v8  ;;  %v602_v8 = vunpack.c.0.s8 %v601_v4 }
  0xed   :  { %147 = vst.msk [vmem:[#allocation2] sm:$0xff] %vm146_vm2, %v128_v10  ;;  %v845_v11 = vpop.f32.mrb[2].mxu0 }
  0xee   :  { %v143_v12 = vadd.f32 %v845_v11, %v803_v6  ;;  %v137_v13 = vpop.f32.mrb[3].mxu0  ;;  %v605_v15 = vsub.s32 %v602_v8, %v573_v2 }
  0xef   :  { %v138_v14 = vadd.f32 %v803_v6, %v137_v13 }
  0xf0   :  { %150 = vst.msk [vmem:[#allocation2 + $0x18] sm:$0xff] %vm146_vm2, %v143_v12 }
  0xf1   :  { %149 = vst.msk [vmem:[#allocation2 + $0x10] sm:$0xff] %vm146_vm2, %v138_v14 }
  0xf3   :  { %v1044_v16 = vld [vmem:[#allocation2 + $0x8] sm:$0xff] }
  0xf4   :  { %v1046_v17 = vld [vmem:[#allocation2] sm:$0xff] }
  0xf5   :  { %v905_v18 = vpack.i.bf16 %v1044_v16, %v1046_v17  ;;  %v874_v19 = vpack.c.bf16 %v1044_v16, %v1046_v17 }
  0xf7   :  { %906 = vrot.lane.b32.xlu0 %v905_v18, %s966_s0  ;;  %875 = vmatprep.subr.bf16.mxu1 %v874_v19  ;;  %v1052_v20 = vld [vmem:[#allocation2 + $0x18] sm:$0xff] }
  0xf8   :  { %877 = vmatpush3.bf16.msra.mxu1 %v874_v19  ;;  %v1054_v21 = vld [vmem:[#allocation2 + $0x10] sm:$0xff] }
  0xf9   :  { %v910_v22 = vpack.i.bf16 %v1052_v20, %v1054_v21  ;;  %v878_v23 = vpack.c.bf16 %v1052_v20, %v1054_v21 }
  0xfb   :  { %911 = vrot.lane.b32.xlu0 %v910_v22, %s966_s0  ;;  %879 = vmatprep.subr.bf16.mxu1 %v878_v23 }
  0xfc   :  { %851 = vmatmul.mubr.msk.f32.vlgmr.msra.gmra.mrb[0].mxu1 %vm165_vm1, %v162_v24 }
  0xfd   :  { %881 = vmatpush3.bf16.msra.mxu1 %v878_v23  ;;  %857 = vmatprep.mubr.msk.f32.mxu1 %vm165_vm1, %v163_v25 }
 0x100   :  { %858 = vmatmul.mubr.msk.f32.vlgmr.msra.gmra.mrb[2].mxu1 %vm165_vm1, %v164_v26 }
 0x101   :  { %871 = vmatprep.mubr.msk.f32.mxu1 %vm165_vm1, %v331_v27 }
 0x169   :  { %v907_v28 = vpop.permute.xlu0 %906 }
 0x16a   :  { %v909_v29 = vunpack.i.h.bf16 %v907_v28  ;;  %v908_v30 = vunpack.i.l.bf16 %v907_v28 }
 0x16c   :  { %v882_v31 = vpack.c.bf16 %v909_v29, %v908_v30 }
 0x16d   :  { %v912_v32 = vpop.permute.xlu0 %911 }
 0x16e   :  { %v914_v33 = vunpack.i.h.bf16 %v912_v32  ;;  %v913_v34 = vunpack.i.l.bf16 %v912_v32  ;;  %883 = vmatprep.subr.bf16.mxu0 %v882_v31 }
 0x16f   :  { %885 = vmatpush3.bf16.msra.mxu0 %v882_v31 }
 0x170   :  { %v886_v36 = vpack.c.bf16 %v914_v33, %v913_v34 }
 0x172   :  { %865 = vmatmul.mubr.msk.f32.vlgmr.msra.gmra.mrb[4].mxu0 %vm165_vm1, %v330_v35  ;;  %887 = vmatprep.subr.bf16.mxu1 %v886_v36 }
 0x173   :  { %889 = vmatpush3.bf16.msra.mxu1 %v886_v36 }
 0x176   :  { %872 = vmatmul.mubr.msk.f32.vlgmr.msra.gmra.mrb[4].mxu1 %vm165_vm1, %v332_v37 }
 0x1cf   :  { %v852_v38 = vpop.f32.mrb[0].mxu1 }
 0x1d0   :  { %v238_v39 = vpop.f32.mrb[1].mxu1 }
 0x1d3   :  { %v859_v40 = vpop.f32.mrb[2].mxu1 }
 0x1d4   :  { %v319_v41 = vpop.f32.mrb[3].mxu1 }
 0x245   :  { %v866_v42 = vpop.f32.mrb[4].mxu0 }
 0x246   :  { %517 = vrot.lane.b32.xlu1 %v866_v42, %s965_s26  ;;  %v413_v43 = vpop.f32.mrb[5].mxu0 }
 0x249   :  { %v873_v44 = vpop.f32.mrb[4].mxu1 }
 0x24a   :  { %515 = vrot.lane.b32.xlu1 %v413_v43, %s965_s26  ;;  %v502_v45 = vpop.f32.mrb[5].mxu1 }
 0x24b   :  { %519 = vrot.lane.b32.xlu0 %v502_v45, %s965_s26 }
 0x24e   :  { %521 = vrot.lane.b32.xlu1 %v873_v44, %s965_s26 }
 0x2b8   :  { %v518_v46 = vpop.permute.xlu1 %517 }
 0x2b9   :  { %v529_v47 = vsel %vm48_vm0, %v852_v38, %v518_v46 }
 0x2ba   :  { %538 = vrot.lane.b32.xlu1 %v529_v47, %s967_s3 }
 0x2bc   :  { %v516_v48 = vpop.permute.xlu1 %515 }
 0x2bd   :  { %v528_v49 = vsel %vm48_vm0, %v238_v39, %v516_v48  ;;  %v520_v50 = vpop.permute.xlu0 %519 }
 0x2be   :  { %536 = vrot.lane.b32.xlu0 %v528_v49, %s967_s3  ;;  %v530_v53 = vsel %vm48_vm0, %v319_v41, %v520_v50 }
 0x2c0   :  { %v522_v51 = vpop.permute.xlu1 %521 }
 0x2c1   :  { %v531_v52 = vsel %vm48_vm0, %v859_v40, %v522_v51 }
 0x2c2   :  { %542 = vrot.lane.b32.xlu1 %v531_v52, %s967_s3  ;;  %540 = vrot.lane.b32.xlu0 %v530_v53, %s967_s3 }
 0x32c   :  { %v539_v54 = vpop.permute.xlu1 %538 }
 0x32d   :  { %v549_v55 = vadd.f32 %v539_v54, %v1044_v16 }
 0x32f   :  { %558 = vrot.lane.b32.xlu1 %v549_v55, %s968_s13 }
 0x330   :  { %v537_v56 = vpop.permute.xlu0 %536 }
 0x331   :  { %v548_v57 = vadd.f32 %v537_v56, %v1046_v17 }
 0x333   :  { %556 = vrot.lane.b32.xlu0 %v548_v57, %s968_s13 }
 0x334   :  { %v543_v58 = vpop.permute.xlu1 %542  ;;  %v541_v59 = vpop.permute.xlu0 %540 }
 0x335   :  { %v551_v60 = vadd.f32 %v543_v58, %v1052_v20  ;;  %v550_v61 = vadd.f32 %v541_v59, %v1054_v21  ;;  %v971_v20 = vmov 0.0  }
 0x337   :  { %562 = vrot.lane.b32.xlu1 %v551_v60, %s968_s13  ;;  %560 = vrot.lane.b32.xlu0 %v550_v61, %s968_s13 }
 0x3a1   :  { %v559_v5 = vpop.permute.xlu1 %558 }
 0x3a2   :  { %v641_v11 = vrot.slane %v559_v5, %v574_v7  ;;  %v634_v27 = vcombine.high %v559_v5, %v971_v20 }
 0x3a4   :  { %v648_v33 = vrot.slane %v634_v27, %v574_v7 }
 0x3a5   :  { %v557_v6 = vpop.permute.xlu0 %556 }
 0x3a6   :  { %v575_v14 = vrot.slane %v557_v6, %v574_v7  ;;  %v568_v28 = vcombine.high %v557_v6, %v971_v20 }
 0x3a8   :  { %v582_v34 = vrot.slane %v568_v28, %v574_v7 }
 0x3a9   :  { %v563_v9 = vpop.permute.xlu1 %562  ;;  %v561_v10 = vpop.permute.xlu0 %560 }
 0x3aa   :  { %v656_v12 = vrot.slane %v563_v9, %v574_v7  ;;  %v590_v13 = vrot.slane %v561_v10, %v574_v7  ;;  %v649_v21 = vcombine.high %v563_v9, %v971_v20  ;;  %v583_v22 = vcombine.high %v561_v10, %v971_v20 }
 0x3ac   :  { %v664_v16 = vcombine.low %v641_v11, %v656_v12  ;;  %v665_v17 = vcombine.high %v641_v11, %v656_v12  ;;  %v598_v18 = vcombine.low %v575_v14, %v590_v13  ;;  %v599_v19 = vcombine.high %v575_v14, %v590_v13 }
 0x3ad   :  { %v663_v29 = vrot.slane %v649_v21, %v574_v7  ;;  %v597_v30 = vrot.slane %v583_v22, %v574_v7 }
 0x3ae   :  { %v672_v23 = vrot.slane %v664_v16, %v605_v15  ;;  %v606_v24 = vrot.slane %v598_v18, %v605_v15  ;;  %v679_v25 = vrot.slane %v665_v17, %v605_v15  ;;  %v613_v26 = vrot.slane %v599_v19, %v605_v15 }
 0x3af   :  { %v680_v35 = vcombine.low %v648_v33, %v663_v29  ;;  %v614_v36 = vcombine.low %v582_v34, %v597_v30  ;;  %v681_v39 = vcombine.high %v648_v33, %v663_v29  ;;  %v615_v40 = vcombine.high %v582_v34, %v597_v30 }
 0x3b0   :  { %733 = vrot.lane.b32.xlu1 %v679_v25, %s972_s14  ;;  %705 = vrot.lane.b32.xlu0 %v613_v26, %s972_s14  ;;  %v696_v31 = vcombine.high %v672_v23, %v971_v20  ;;  %v630_v32 = vcombine.high %v606_v24, %v971_v20  ;;  %v697_v37 = vcombine.high %v679_v25, %v971_v20 }
 0x3b1   :  { %v631_v38 = vcombine.high %v613_v26, %v971_v20  ;;  %v688_v41 = vrot.slane %v680_v35, %v605_v15  ;;  %v622_v42 = vrot.slane %v614_v36, %v605_v15  ;;  %v695_v43 = vrot.slane %v681_v39, %v605_v15 }
 0x3b2   :  { %v629_v44 = vrot.slane %v615_v40, %v605_v15 }
 0x3b3   :  { %v698_v45 = vcombine.high %v688_v41, %v971_v20  ;;  %v632_v46 = vcombine.high %v622_v42, %v971_v20  ;;  %v699_v47 = vcombine.high %v695_v43, %v971_v20 }
 0x3b4   :  { %729 = vrot.lane.b32.xlu1 %v696_v31, %s967_s3  ;;  %701 = vrot.lane.b32.xlu0 %v630_v32, %s967_s3  ;;  %v633_v48 = vcombine.high %v629_v44, %v971_v20 }
 0x3b8   :  { %737 = vrot.lane.b32.xlu1 %v697_v37, %s973_s15  ;;  %709 = vrot.lane.b32.xlu0 %v631_v38, %s973_s15 }
 0x3bc   :  { %741 = vrot.lane.b32.xlu1 %v688_v41, %s974_s16  ;;  %713 = vrot.lane.b32.xlu0 %v622_v42, %s974_s16 }
 0x3c0   :  { %749 = vrot.lane.b32.xlu1 %v695_v43, %s975_s17  ;;  %721 = vrot.lane.b32.xlu0 %v629_v44, %s975_s17 }
 0x3c4   :  { %745 = vrot.lane.b32.xlu1 %v698_v45, %s976_s18  ;;  %717 = vrot.lane.b32.xlu0 %v632_v46, %s976_s18 }
 0x3c8   :  { %753 = vrot.lane.b32.xlu1 %v699_v47, %s968_s13  ;;  %725 = vrot.lane.b32.xlu0 %v633_v48, %s968_s13 }
 0x422   :  { %v734_v49 = vpop.permute.xlu1 %733  ;;  %v706_v50 = vpop.permute.xlu0 %705 }
 0x426   :  { %v730_v51 = vpop.permute.xlu1 %729  ;;  %v702_v52 = vpop.permute.xlu0 %701 }
 0x427   :  { %v769_v57 = vsel %vm165_vm1, %v672_v23, %v730_v51  ;;  %v756_v58 = vsel %vm165_vm1, %v606_v24, %v702_v52 }
 0x428   :  { %v770_v61 = vsel %vm146_vm2, %v769_v57, %v734_v49  ;;  %v758_v62 = vsel %vm146_vm2, %v756_v58, %v706_v50 }
 0x42a   :  { %v738_v53 = vpop.permute.xlu1 %737  ;;  %v710_v54 = vpop.permute.xlu0 %709 }
 0x42b   :  { %v771_v63 = vsel %vm759_vm3, %v770_v61, %v738_v53  ;;  %v760_v0 = vsel %vm759_vm3, %v758_v62, %v710_v54 }
 0x42e   :  { %v742_v55 = vpop.permute.xlu1 %741  ;;  %v714_v56 = vpop.permute.xlu0 %713 }
 0x42f   :  { %v772_v1 = vsel %vm761_vm4, %v771_v63, %v742_v55  ;;  %v762_v2 = vsel %vm761_vm4, %v760_v0, %v714_v56 }
 0x432   :  { %v750_v59 = vpop.permute.xlu1 %749  ;;  %v722_v60 = vpop.permute.xlu0 %721 }
 0x436   :  { %v746_v3 = vpop.permute.xlu1 %745  ;;  %v718_v4 = vpop.permute.xlu0 %717 }
 0x437   :  { %v773_v5 = vsel %vm763_vm5, %v772_v1, %v746_v3  ;;  %v764_v6 = vsel %vm763_vm5, %v762_v2, %v718_v4 }
 0x438   :  { %v774_v7 = vsel %vm765_vm6, %v773_v5, %v750_v59  ;;  %v766_v9 = vsel %vm765_vm6, %v764_v6, %v722_v60 }
 0x43a   :  { %v754_v8 = vpop.permute.xlu1 %753  ;;  %v726_v10 = vpop.permute.xlu0 %725 }
 0x43b   :  { %v775_v11 = vsel %vm767_vm7, %v774_v7, %v754_v8  ;;  %v768_v12 = vsel %vm767_vm7, %v766_v9, %v726_v10 }
 0x43c   :  { %v778_v13 = vcombine.low %v768_v12, %v775_v11 }
 0x43e   :  { %816 = vst.sshfl [vmem:[#allocation6] sm:$0x33 pattern:$0x76325410] %v778_v13 }
 0x43f   :  { %948 = shalt.err (!%p945_p12)
}
 0x440   :  { %s949_s24 = scalar_lea.hbm %s1110_s4, 64 }
 0x441   :  { %p950_p13 = scmp.ne.s32.totalorder %s1110_s4, %s949_s24  ;;  %p953_p0 = scmp.lt.u32.totalorder %s949_s24, %s1110_s4 }
 0x443   :  { %p955_p1 = pnand %p953_p0, %p950_p13 }
 0x445   :  { %958 = shalt.err (!%p955_p1)
}
 0x446   :  { %797 = dma.vmem_to_hbm [thread:$0]  %s795_s20, 64, %s1110_s4, [#allocation5]  }
 0x447   :  { %961 = dma.done.wait [#allocation5], 64  }
 0x448   :  { %962 = vsyncadd [#allocation5], 4294967232 }
 0x449   :  { %801 = vsyncpa [#allocation4], 1 }
 0x44a   :  { %802 = vsyncpa [#allocation5], 1 }

</bundles_post_ra>
